<compile_context>
chip_gen: v7x
topology: tpu7x:2x2x1
jax: 0.10.0
libtpu: 0.0.40
codegen_flags: <defaults>
</compile_context>

<pallas_src>
import functools

import jax
import jax.numpy as jnp
from jax.experimental import pallas as pl
from jax.experimental.pallas import tpu as pltpu  # noqa: F401  (kept for TPU-specific params)


def _lstm_fused_kernel(x_ref, h_ref, c_ref, w_ref, b_ref,
                       out_ref, hn_ref, cn_ref, *,
                       indim: int, hdim: int, numlayers: int, dmax: int):
    """Fused multi-layer, single-time-step LSTM.

    x_ref:   (B, indim)            input at t (f32)
    h_ref:   (B, L, hdim)          previous hidden states, module layout (f32)
    c_ref:   (B, L, hdim)          previous cell states (f32)
    w_ref:   (L, dmax+hdim, 4H)    packed [W_ih^T ; W_hh^T] per layer (bf16)
    b_ref:   (L, 1, 4H)            b_ih + b_hh per layer (f32)
    out_ref: (B, hdim)             top-layer output (== h_n of last layer)
    hn_ref:  (B, L, hdim)          new hidden states (aliased with h_ref's buffer)
    cn_ref:  (B, L, hdim)          new cell states   (aliased with c_ref's buffer)

    Gate ordering along the 4H axis follows PyTorch: i, f, g, o.
    """
    H = hdim
    B = x_ref.shape[0]

    x = x_ref[...]                                            # (B, indim) f32
    if indim < dmax:                                          # static zero-pad to dmax lanes
        x = jnp.concatenate([x, jnp.zeros((B, dmax - indim), x.dtype)], axis=-1)

    h_new = None
    for layer in range(numlayers):                            # static unroll over layers
        h_prev = h_ref[:, layer, :]                           # (B, H) f32
        c_prev = c_ref[:, layer, :]

        # Fused input+recurrent matmul: one MXU dot on [x, h] @ [W_ih^T ; W_hh^T].
        xcat = jnp.concatenate([x, h_prev], axis=-1).astype(jnp.bfloat16)   # (B, dmax+H)
        gates = (jnp.dot(xcat, w_ref[layer], preferred_element_type=jnp.float32)
                 + b_ref[layer])                              # (B, 4H) f32

        # Whole-tile nonlinearities (2 EUP passes), then slice i, f, g, o.
        sig = jax.nn.sigmoid(gates)
        tnh = jnp.tanh(gates)
        i_g = sig[:, 0 * H:1 * H]
        f_g = sig[:, 1 * H:2 * H]
        g_g = tnh[:, 2 * H:3 * H]
        o_g = sig[:, 3 * H:4 * H]

        c_new = f_g * c_prev + i_g * g_g
        h_new = o_g * jnp.tanh(c_new)

        hn_ref[:, layer, :] = h_new
        cn_ref[:, layer, :] = c_new

        x = h_new                                             # input to next layer
        if hdim < dmax:
            x = jnp.concatenate([x, jnp.zeros((B, dmax - hdim), x.dtype)], axis=-1)

    out_ref[...] = h_new                                      # top layer output


def _lstm_transition_step(x, h, c, w_packed, b_packed, *,
                          indim: int, hdim: int, numlayers: int, dmax: int):
    """Single pallas_call for one decode step over all layers."""
    B = x.shape[0]
    H, L = hdim, numlayers
    kpad = dmax + hdim

    kernel = functools.partial(_lstm_fused_kernel, indim=indim, hdim=hdim,
                               numlayers=numlayers, dmax=dmax)
    full = lambda shape: pl.BlockSpec(shape, lambda: (0,) * len(shape))

    out, h_n, c_n = pl.pallas_call(
        kernel,
        out_shape=(
            jax.ShapeDtypeStruct((B, H), jnp.float32),
            jax.ShapeDtypeStruct((B, L, H), jnp.float32),
            jax.ShapeDtypeStruct((B, L, H), jnp.float32),
        ),
        in_specs=[
            full((B, indim)),          # x
            full((B, L, H)),           # h state (module layout, no transpose)
            full((B, L, H)),           # c state
            full((L, kpad, 4 * H)),    # packed weights (bf16)
            full((L, 1, 4 * H)),       # folded biases (f32)
        ],
        out_specs=(
            full((B, H)),
            full((B, L, H)),
            full((B, L, H)),
        ),
        # Update the state in place: h -> h_n, c -> c_n.
        input_output_aliases={1: 1, 2: 2},
    )(x, h, c, w_packed, b_packed)
    return out, h_n, c_n


class LSTMTransitionPallas:
    """JAX/Pallas re-implementation of parseq LSTMTransition forward (eval mode)."""

    def __init__(self, indim, hdim, num_layers=1, dropout=0.0, dropout_rec=0.0, key=None):
        assert dropout == 0.0 and dropout_rec == 0.0, "only the p=0 (eval) path is implemented"
        self.indim, self.hdim, self.numlayers = indim, hdim, num_layers
        self.dmax = max(indim, hdim)           # padded per-layer input width
        self.kpad = self.dmax + hdim           # packed K for the fused dot

        key = key if key is not None else jax.random.PRNGKey(0)
        bound = 1.0 / (hdim ** 0.5)            # PyTorch nn.LSTM init: U(-1/sqrt(H), 1/sqrt(H))
        w_rows, b_rows = [], []
        for layer in range(num_layers):
            layer_in = indim if layer == 0 else hdim
            key, k1, k2, k3, k4 = jax.random.split(key, 5)
            w_ih = jax.random.uniform(k1, (4 * hdim, layer_in), jnp.float32, -bound, bound)
            w_hh = jax.random.uniform(k2, (4 * hdim, hdim), jnp.float32, -bound, bound)
            b_ih = jax.random.uniform(k3, (4 * hdim,), jnp.float32, -bound, bound)
            b_hh = jax.random.uniform(k4, (4 * hdim,), jnp.float32, -bound, bound)
            # Pack [W_ih^T (zero-padded to dmax rows) ; W_hh^T] and fold the two biases.
            w = jnp.zeros((self.kpad, 4 * hdim), jnp.float32)
            w = w.at[:layer_in, :].set(w_ih.T)
            w = w.at[self.dmax:, :].set(w_hh.T)
            w_rows.append(w)
            b_rows.append((b_ih + b_hh)[None, :])
        self.w_packed = jnp.stack(w_rows, axis=0).astype(jnp.bfloat16)  # (L, Kpad, 4H) bf16
        self.b_packed = jnp.stack(b_rows, axis=0)                        # (L, 1, 4H)  f32

    def get_init_state(self, batsize):
        shp = (batsize, self.numlayers, self.hdim)
        return {
            "h": jnp.zeros(shp, jnp.float32),
            "c": jnp.zeros(shp, jnp.float32),
            # dropout_rec.p == 0 -> masks are all ones (kept for API fidelity, unused).
            "h_dropout": jnp.ones(shp, jnp.float32),
            "c_dropout": jnp.ones(shp, jnp.float32),
        }

    def forward(self, inp, state):
        """
        inp:   (batsize, indim)
        state: dict with h, c of shape (batsize, numlayers, hdim)
        returns (out (batsize, hdim), new state)
        """
        out, h_n, c_n = _lstm_transition_step(
            inp, state["h"], state["c"], self.w_packed, self.b_packed,
            indim=self.indim, hdim=self.hdim, numlayers=self.numlayers, dmax=self.dmax)
        new_state = dict(state)
        new_state["h"] = h_n
        new_state["c"] = c_n
        return out, new_state


def _reference_forward(model, inp, state):
    """Pure-JAX reference using the same (bf16-weight, f32-accumulate) math."""
    H, dmax, L = model.hdim, model.dmax, model.numlayers
    B = inp.shape[0]
    x = inp
    if model.indim < dmax:
        x = jnp.concatenate([x, jnp.zeros((B, dmax - model.indim), x.dtype)], axis=-1)
    hs, cs = [], []
    h_n = None
    for layer in range(L):
        h_prev = state["h"][:, layer, :]
        c_prev = state["c"][:, layer, :]
        xcat = jnp.concatenate([x, h_prev], axis=-1).astype(jnp.bfloat16)
        gates = (jnp.dot(xcat, model.w_packed[layer], preferred_element_type=jnp.float32)
                 + model.b_packed[layer])
        i = jax.nn.sigmoid(gates[:, 0 * H:1 * H])
        f = jax.nn.sigmoid(gates[:, 1 * H:2 * H])
        g = jnp.tanh(gates[:, 2 * H:3 * H])
        o = jax.nn.sigmoid(gates[:, 3 * H:4 * H])
        c_n = f * c_prev + i * g
        h_n = o * jnp.tanh(c_n)
        hs.append(h_n)
        cs.append(c_n)
        x = h_n
        if H < dmax:
            x = jnp.concatenate([x, jnp.zeros((B, dmax - H), x.dtype)], axis=-1)
    return h_n, {"h": jnp.stack(hs, axis=1), "c": jnp.stack(cs, axis=1)}


if __name__ == "__main__":
    batsize, indim, hdim, num_layers = 8, 32, 32, 1

    key = jax.random.PRNGKey(0)
    k_inp, k_h, k_c, k_model = jax.random.split(key, 4)

    model = LSTMTransitionPallas(indim, hdim, num_layers, key=k_model)

    inp = jax.random.normal(k_inp, (batsize, indim), jnp.float32)
    state = model.get_init_state(batsize)
    # Non-trivial state so the recurrent path is exercised.
    state["h"] = jax.random.normal(k_h, (batsize, num_layers, hdim), jnp.float32)
    state["c"] = jax.random.normal(k_c, (batsize, num_layers, hdim), jnp.float32)

    # Reference first (state outputs are aliased in the kernel call; values stay safe
    # either way, this just keeps the comparison unambiguous).
    ref_out, ref_state = _reference_forward(model, inp, state)
    ref_out = jax.block_until_ready(ref_out)

    out, new_state = model.forward(inp, state)
    out = jax.block_until_ready(out)
    new_state = {k: jax.block_until_ready(v) for k, v in new_state.items()}

    assert jnp.allclose(out, ref_out, atol=1e-4, rtol=1e-4)
    assert jnp.allclose(new_state["h"], ref_state["h"], atol=1e-4, rtol=1e-4)
    assert jnp.allclose(new_state["c"], ref_state["c"], atol=1e-4, rtol=1e-4)

    print("KERNEL_OK")
</pallas_src>

<mosaic_0001>
module attributes {stable_mosaic.version = 11 : i64} {
  func.func @_lstm_fused_kernel(%arg0: memref<8x32xf32, #tpu.memory_space<vmem>>, %arg1: memref<8x1x32xf32, #tpu.memory_space<vmem>>, %arg2: memref<8x1x32xf32, #tpu.memory_space<vmem>>, %arg3: memref<1x64x128xbf16, #tpu.memory_space<vmem>>, %arg4: memref<1x1x128xf32, #tpu.memory_space<vmem>>, %arg5: memref<8x32xf32, #tpu.memory_space<vmem>>, %arg6: memref<8x1x32xf32, #tpu.memory_space<vmem>>, %arg7: memref<8x1x32xf32, #tpu.memory_space<vmem>>) attributes {dimension_semantics = [], scalar_prefetch = 0 : i64, scratch_operands = 0 : i64, tpu.core_type = #tpu.core_type<tc>} {
    %c0 = arith.constant 0 : index
    %c0_0 = arith.constant 0 : index
    %0 = vector.load %arg0[%c0, %c0_0] : memref<8x32xf32, #tpu.memory_space<vmem>>, vector<8x32xf32>
    %c0_1 = arith.constant 0 : index
    %c0_2 = arith.constant 0 : index
    %c0_3 = arith.constant 0 : index
    %1 = vector.load %arg1[%c0_1, %c0_2, %c0_3] : memref<8x1x32xf32, #tpu.memory_space<vmem>>, vector<8x1x32xf32>
    %2 = vector.shape_cast %1 : vector<8x1x32xf32> to vector<8x32xf32>
    %c0_4 = arith.constant 0 : index
    %c0_5 = arith.constant 0 : index
    %c0_6 = arith.constant 0 : index
    %3 = vector.load %arg2[%c0_4, %c0_5, %c0_6] : memref<8x1x32xf32, #tpu.memory_space<vmem>>, vector<8x1x32xf32>
    %4 = vector.shape_cast %3 : vector<8x1x32xf32> to vector<8x32xf32>
    %5 = tpu.concatenate %0, %2 in 1 : vector<8x32xf32>, vector<8x32xf32> -> vector<8x64xf32>
    %6 = arith.truncf %5 : vector<8x64xf32> to vector<8x64xbf16>
    %c0_7 = arith.constant 0 : index
    %c0_8 = arith.constant 0 : index
    %c0_9 = arith.constant 0 : index
    %7 = vector.load %arg3[%c0_7, %c0_8, %c0_9] : memref<1x64x128xbf16, #tpu.memory_space<vmem>>, vector<1x64x128xbf16>
    %8 = vector.shape_cast %7 : vector<1x64x128xbf16> to vector<64x128xbf16>
    %cst = arith.constant dense<0.000000e+00> : vector<8x128xf32>
    %9 = tpu.matmul %6, %8, %cst {dimension_numbers = #tpu.dot_dimension_numbers<[1], [0], [0], [1], [0, 0, 1, 1], [], []>} : vector<8x64xbf16>, vector<64x128xbf16>, vector<8x128xf32> -> vector<8x128xf32>
    %c0_10 = arith.constant 0 : index
    %c0_11 = arith.constant 0 : index
    %c0_12 = arith.constant 0 : index
    %10 = vector.load %arg4[%c0_10, %c0_11, %c0_12] : memref<1x1x128xf32, #tpu.memory_space<vmem>>, vector<1x1x128xf32>
    %11 = vector.shape_cast %10 : vector<1x1x128xf32> to vector<1x128xf32>
    %12 = vector.broadcast %11 : vector<1x128xf32> to vector<8x128xf32>
    %13 = arith.addf %9, %12 : vector<8x128xf32>
    %14 = arith.negf %13 : vector<8x128xf32>
    %15 = math.exp %14 : vector<8x128xf32>
    %cst_13 = arith.constant 1.000000e+00 : f32
    %16 = vector.broadcast %cst_13 : f32 to vector<8x128xf32>
    %17 = arith.addf %16, %15 : vector<8x128xf32>
    %18 = arith.divf %16, %17 : vector<8x128xf32>
    %19 = math.tanh %13 : vector<8x128xf32>
    %20 = vector.extract_strided_slice %18 {offsets = [0, 0], sizes = [8, 32], strides = [1, 1]} : vector<8x128xf32> to vector<8x32xf32>
    %21 = vector.extract_strided_slice %18 {offsets = [0, 32], sizes = [8, 32], strides = [1, 1]} : vector<8x128xf32> to vector<8x32xf32>
    %22 = vector.extract_strided_slice %19 {offsets = [0, 64], sizes = [8, 32], strides = [1, 1]} : vector<8x128xf32> to vector<8x32xf32>
    %23 = vector.extract_strided_slice %18 {offsets = [0, 96], sizes = [8, 32], strides = [1, 1]} : vector<8x128xf32> to vector<8x32xf32>
    %24 = arith.mulf %21, %4 : vector<8x32xf32>
    %25 = arith.mulf %20, %22 : vector<8x32xf32>
    %26 = arith.addf %24, %25 : vector<8x32xf32>
    %27 = math.tanh %26 : vector<8x32xf32>
    %28 = arith.mulf %23, %27 : vector<8x32xf32>
    %c0_14 = arith.constant 0 : index
    %c0_15 = arith.constant 0 : index
    %c0_16 = arith.constant 0 : index
    %29 = vector.load %arg6[%c0_14, %c0_15, %c0_16] : memref<8x1x32xf32, #tpu.memory_space<vmem>>, vector<8x1x32xf32>
    %30 = vector.shape_cast %29 : vector<8x1x32xf32> to vector<8x32xf32>
    %31 = vector.shape_cast %28 : vector<8x32xf32> to vector<8x1x32xf32>
    tpu.vector_store %arg6[%c0_14, %c0_15, %c0_16], %31 {strides = array<i32>} : memref<8x1x32xf32, #tpu.memory_space<vmem>>, vector<8x1x32xf32>,
    %c0_17 = arith.constant 0 : index
    %c0_18 = arith.constant 0 : index
    %c0_19 = arith.constant 0 : index
    %32 = vector.load %arg7[%c0_17, %c0_18, %c0_19] : memref<8x1x32xf32, #tpu.memory_space<vmem>>, vector<8x1x32xf32>
    %33 = vector.shape_cast %32 : vector<8x1x32xf32> to vector<8x32xf32>
    %34 = vector.shape_cast %26 : vector<8x32xf32> to vector<8x1x32xf32>
    tpu.vector_store %arg7[%c0_17, %c0_18, %c0_19], %34 {strides = array<i32>} : memref<8x1x32xf32, #tpu.memory_space<vmem>>, vector<8x1x32xf32>,
    %c0_20 = arith.constant 0 : index
    %c0_21 = arith.constant 0 : index
    %35 = vector.load %arg5[%c0_20, %c0_21] : memref<8x32xf32, #tpu.memory_space<vmem>>, vector<8x32xf32>
    tpu.vector_store %arg5[%c0_20, %c0_21], %28 {strides = array<i32>} : memref<8x32xf32, #tpu.memory_space<vmem>>, vector<8x32xf32>,
    return
  }
}

</mosaic_0001>

<bundles_post_ra>
// kernel: tpu_custom_call.1
= control target key start
LH: loop header
LB: loop body
LE: loop exit
PB: predicated region body
PF: predicated region fallthrough
CT: control target
= control target key end

     0   :  { %13 = vsyncpa [#allocation3], 0  ;;  %s993_s0 = inlined_call_operand.vmem [shape: f32[8,32], index: 0, kind: input, shape index: {}]   ;;  %s994_s1 = inlined_call_operand.hbm [shape: f32[8,1,32], index: 1, kind: input, shape index: {}, may-alias: {1,6}]   ;;  %s995_s2 = inlined_call_operand.hbm [shape: f32[8,1,32], index: 2, kind: input, shape index: {}, may-alias: {2,7}]   ;;  %s996_s3 = inlined_call_operand.vmem [shape: bf16[1,64,128], index: 3, kind: input, shape index: {}]   ;;  %s997_s4 = inlined_call_operand.vmem [shape: f32[1,1,128], index: 4, kind: input, shape index: {}]   ;;  %s998_s5 = inlined_call_operand.hbm [shape: f32[8,32], index: 5, kind: output, shape index: {0}]   ;;  %s999_s6 = inlined_call_operand.hbm [shape: f32[8,1,32], index: 6, kind: output, shape index: {1}, may-alias: {1,6}]   ;;  %s1000_s7 = inlined_call_operand.hbm [shape: f32[8,1,32], index: 7, kind: output, shape index: {2}, may-alias: {2,7}]  }
   0x1   :  { %14 = vsyncpa [#allocation6], 0 }
   0x2   :  { %15 = vsyncpa [#allocation4], 0 }
   0x3   :  { %16 = vsyncpa [#allocation9], 0  ;;  %s748_s24 = smov [#allocation2]   ;;  %s630_s28 = scalar_lea.hbm %s994_s1, 128 }
   0x4   :  { %s24_s25 = sshll.u32 %s748_s24, 4  ;;  %p631_p0 = scmp.ne.s32.totalorder %s994_s1, %s630_s28  ;;  %s25_s25 = int_to_ptr.vmem [resolvable:$true] %s24_s25 }
   0x5   :  { %p634_p1 = scmp.lt.u32.totalorder %s630_s28, %s994_s1 }
   0x7   :  { %p636_p2 = pnand %p634_p1, %p631_p0 }
   0x9   :  { %639 = shalt.err (!%p636_p2)
}
   0xa   :  { %s640_s10 = scalar_lea.vmem %s25_s25, 128  ;;  %p645_p4 = scmp.lt.s32.totalorder %s25_s25, %s25_s25 }
   0xb   :  { %p641_p3 = scmp.ne.s32.totalorder %s25_s25, %s640_s10  ;;  %p646_p5 = scmp.lt.s32.totalorder %s640_s10, %s640_s10 }
   0xd   :  { %p647_p6 = por %p646_p5, %p645_p4 }
   0xf   :  { %p648_p7 = pnand %p647_p6, %p641_p3 }
  0x11   :  { %651 = shalt.err (!%p648_p7)
}
  0x12   :  { %s749_s11 = smov 16   ;;  %s750_s12 = smov 1  }
  0x13   :  { %30 = dma.hbm_to_vmem [thread:$0]  %s994_s1, 128, %s25_s25, [#allocation3], %s749_s11, %s749_s11, %s750_s12  }
  0x14   :  { %s751_s15 = smov [#allocation5]   ;;  %s652_s19 = scalar_lea.hbm %s995_s2, 128 }
  0x15   :  { %s36_s16 = sshll.u32 %s751_s15, 4  ;;  %p653_p8 = scmp.ne.s32.totalorder %s995_s2, %s652_s19  ;;  %s37_s16 = int_to_ptr.vmem [resolvable:$true] %s36_s16 }
  0x16   :  { %p656_p9 = scmp.lt.u32.totalorder %s652_s19, %s995_s2 }
  0x18   :  { %p658_p10 = pnand %p656_p9, %p653_p8 }
  0x1a   :  { %661 = shalt.err (!%p658_p10)
}
  0x1b   :  { %s662_s24 = scalar_lea.vmem %s37_s16, 128  ;;  %p667_p12 = scmp.lt.s32.totalorder %s37_s16, %s37_s16 }
  0x1c   :  { %p663_p11 = scmp.ne.s32.totalorder %s37_s16, %s662_s24  ;;  %p668_p13 = scmp.lt.s32.totalorder %s662_s24, %s662_s24 }
  0x1e   :  { %p669_p0 = por %p668_p13, %p667_p12 }
  0x20   :  { %p670_p1 = pnand %p669_p0, %p663_p11 }
  0x22   :  { %673 = shalt.err (!%p670_p1)
}
  0x23   :  { %42 = dma.hbm_to_vmem [thread:$0]  %s995_s2, 128, %s37_s16, [#allocation6], %s749_s11, %s749_s11, %s750_s12  }
  0x24   :  { %740 = dma.done.wait [#allocation3], 128  }
  0x25   :  { %741 = vsyncadd [#allocation3], 4294967168 }
  0x26   :  { %742 = dma.done.wait [#allocation6], 128  }
  0x27   :  { %743 = vsyncadd [#allocation6], 4294967168  ;;  %v86_v0 = vlaneseq  ;;  %v752_v1 = vmov 1966171168   ;;  %v753_v3 = vmov 0.0   ;;  %v618_v20 = vld [vmem:[%s996_s3] sm:$0xff]  }
  0x28   :  { %v84_v2 = vunpack.c.l.s4 %v752_v1  ;;  %593 = vmatprep.subr.bf16.mxu0 %v753_v3  ;;  %v55_v7 = vld [vmem:[#allocation2] sm:$0x1]  ;;  %v56_v8 = vld [vmem:[#allocation2 + $0x1] sm:$0x1]  ;;  %v57_v9 = vld [vmem:[#allocation2 + $0x2] sm:$0x1] }
  0x29   :  { %v831_v4 = vshrl.u32 %v86_v0, 7  ;;  %v58_v10 = vld [vmem:[#allocation2 + $0x3] sm:$0x1]  ;;  %v59_v11 = vld [vmem:[#allocation2 + $0x4] sm:$0x1]  ;;  %v79_v13 = vcombine.low %v55_v7, %v56_v8  ;;  %vm754_vm0 = vmmov 0   ;;  %594 = vmatpush3.bf16.msra.mxu0 %v618_v20 }
  0x2a   :  { %v85_v5 = vunpack.c.0.s8 %v84_v2  ;;  %v60_v12 = vld [vmem:[#allocation2 + $0x5] sm:$0x1]  ;;  %v61_v14 = vld [vmem:[#allocation2 + $0x6] sm:$0x1]  ;;  %v62_v15 = vld [vmem:[#allocation2 + $0x7] sm:$0x1]  ;;  %v80_v16 = vcombine.low %v57_v9, %v58_v10  ;;  %601 = vmatprep.mubr.msk.bf16.mxu0 %vm754_vm0, %v753_v3  ;;  %595 = vmatprep.subr.bf16.mxu0 %v753_v3 }
  0x2b   :  { %v81_v17 = vcombine.low %v59_v11, %v60_v12  ;;  %v82_v18 = vcombine.low %v61_v14, %v62_v15  ;;  %v619_v24 = vld [vmem:[%s996_s3 + $0x8] sm:$0xff]   ;;  %v620_v36 = vld [vmem:[%s996_s3 + $0x10] sm:$0xff]   ;;  %s755_s8 = smov 32   ;;  %v621_v47 = vld [vmem:[%s996_s3 + $0x18] sm:$0xff]   ;;  %vm131_vm1 = vcmask 261120   ;;  %vm173_vm2 = vcmask 523264  }
  0x2c   :  { %v834_v6 = vsub.s32 %v85_v5, %v831_v4  ;;  %v63_v27 = vld [vmem:[#allocation5] sm:$0x1]  ;;  %v64_v28 = vld [vmem:[#allocation5 + $0x1] sm:$0x1]  ;;  %v65_v29 = vld [vmem:[#allocation5 + $0x2] sm:$0x1] }
  0x2d   :  { %v66_v31 = vld [vmem:[#allocation5 + $0x3] sm:$0x1]  ;;  %v67_v32 = vld [vmem:[#allocation5 + $0x4] sm:$0x1]  ;;  %v68_v33 = vld [vmem:[#allocation5 + $0x5] sm:$0x1]  ;;  %v232_v34 = vcombine.low %v63_v27, %v64_v28  ;;  %596 = vmatpush3.bf16.msra.mxu0 %v619_v24 }
  0x2e   :  { %v89_v19 = vrot.slane %v79_v13, %v834_v6  ;;  %v96_v21 = vrot.slane %v80_v16, %v834_v6  ;;  %v103_v22 = vrot.slane %v81_v17, %v834_v6  ;;  %v110_v23 = vrot.slane %v82_v18, %v834_v6  ;;  %v69_v37 = vld [vmem:[#allocation5 + $0x6] sm:$0x1]  ;;  %v70_v38 = vld [vmem:[#allocation5 + $0x7] sm:$0x1]  ;;  %597 = vmatprep.subr.bf16.mxu0 %v753_v3  ;;  %v54_v53 = vld [vmem:[%s993_s0] sm:$0xff]  ;;  %s756_s16 = smov 64  }
  0x2f   :  { %v233_v39 = vcombine.low %v65_v29, %v66_v31  ;;  %v234_v40 = vcombine.low %v67_v32, %v68_v33  ;;  %v235_v41 = vcombine.low %v69_v37, %v70_v38  ;;  %v242_v42 = vrot.slane %v232_v34, %v834_v6  ;;  %v581_v57 = vld [vmem:[%s997_s4] ss:$0 sm:$0xff]  ;;  %s757_s0 = smov 96   ;;  %s758_s4 = smov [#allocation8]  }
  0x30   :  { %v111_v25 = vcombine.low %v89_v19, %v96_v21  ;;  %v112_v26 = vcombine.low %v103_v22, %v110_v23  ;;  %v873_v14 = vsub.s32 0, %v831_v4  ;;  %vm407_vm3 = vcmask 253952   ;;  %s549_s17 = sshll.u32 %s758_s4, 4  ;;  %s759_s18 = smov [#allocation7]   ;;  %s550_s17 = int_to_ptr.vmem [resolvable:$true] %s549_s17 }
  0x31   :  { %v249_v44 = vrot.slane %v233_v39, %v834_v6  ;;  %v256_v45 = vrot.slane %v234_v40, %v834_v6  ;;  %v263_v46 = vrot.slane %v235_v41, %v834_v6  ;;  %598 = vmatpush3.bf16.msra.mxu0 %v620_v36  ;;  %s540_s19 = sshll.u32 %s759_s18, 4  ;;  %s760_s20 = smov [#allocation10]   ;;  %s935_s19 = int_to_ptr.vmem [resolvable:$true] %s540_s19 }
  0x32   :  { %v119_v30 = vrot.slane %v111_v25, %v834_v6  ;;  %v126_v35 = vrot.slane %v112_v26, %v834_v6  ;;  %599 = vmatprep.subr.bf16.mxu0 %v753_v3  ;;  %s561_s21 = sshll.u32 %s760_s20, 4  ;;  %s674_s22 = scalar_lea.vmem %s550_s17, 128  ;;  %s953_s21 = int_to_ptr.vmem [resolvable:$true] %s561_s21 }
  0x33   :  { %v264_v48 = vcombine.low %v242_v42, %v249_v44  ;;  %v265_v49 = vcombine.low %v256_v45, %v263_v46  ;;  %p675_p2 = scmp.ne.s32.totalorder %s550_s17, %s674_s22  ;;  %p679_p3 = scmp.lt.s32.totalorder %s550_s17, %s550_s17 }
  0x34   :  { %v127_v43 = vcombine.low %v119_v30, %v126_v35  ;;  %p680_p4 = scmp.lt.s32.totalorder %s674_s22, %s674_s22 }
  0x35   :  { %v272_v50 = vrot.slane %v264_v48, %v834_v6  ;;  %v279_v51 = vrot.slane %v265_v49, %v834_v6  ;;  %600 = vmatpush3.bf16.msra.mxu0 %v621_v47 }
  0x36   :  { %128 = vrot.lane.b32.xlu0 %v127_v43, %s755_s8  ;;  %p681_p5 = por %p680_p4, %p679_p3 }
  0x37   :  { %v280_v52 = vcombine.low %v272_v50, %v279_v51 }
  0x38   :  { %p682_p6 = pnand %p681_p5, %p675_p2 }
  0x39   :  { %281 = vrot.lane.b32.xlu1 %v280_v52, %s755_s8 }
  0xa8   :  { %v129_v54 = vpop.permute.xlu0 %128 }
  0xa9   :  { %v132_v55 = vsel %vm131_vm1, %v54_v53, %v129_v54 }
  0xaa   :  { %v133_v56 = vpack.c.bf16 %v132_v55, %v132_v55 }
  0xab   :  { %v282_v8 = vpop.permute.xlu1 %281 }
  0xac   :  { %602 = vmatmul.mubr.msk.bf16.vlgmr.msra.gmra.mrb[0].mxu0 %vm173_vm2, %v133_v56 }
 0x17f   :  { %v211_v58 = vpop.f32.mrb[0].mxu0 }
 0x180   :  { %v212_v59 = vadd.f32 %v581_v57, %v211_v58  ;;  %v603_v60 = vpop.f32.mrb[1].mxu0 }
 0x181   :  { %v214_v61 = vpop.f32.mrb[2].mxu0 }
 0x182   :  { %622 = vtanh.f32 %v212_v59  ;;  %v604_v62 = vpop.f32.mrb[3].mxu0  ;;  %v587_v0 = vmul.f32 -1.442695, %v212_v59 }
 0x184   :  { %624 = vpow2.f32 %v587_v0 }
 0x18c   :  { %v623_v63 = vpop.eup %622 }
 0x18d   :  { %286 = vrot.lane.b32.xlu0 %v623_v63, %s756_s16 }
 0x18e   :  { %v625_v1 = vpop.eup %624 }
 0x18f   :  { %v220_v2 = vadd.f32 1.0, %v625_v1 }
 0x191   :  { %626 = vrcp.f32 %v220_v2 }
 0x19b   :  { %v627_v3 = vpop.eup %626 }
 0x19c   :  { %v284_v9 = vmul.f32 %v627_v3, %v282_v8 }
 0x1ff   :  { %v287_v5 = vpop.permute.xlu0 %286 }
 0x200   :  { %v289_v7 = vmul.f32 %v627_v3, %v287_v5 }
 0x202   :  { %291 = vrot.lane.b32.xlu1 %v289_v7, %s755_s8 }
 0x274   :  { %v292_v10 = vpop.permute.xlu1 %291 }
 0x275   :  { %v294_v11 = vadd.f32 %v292_v10, %v284_v9 }
 0x277   :  { %628 = vtanh.f32 %v294_v11  ;;  %v417_v12 = vcombine.high %v294_v11, %v294_v11  ;;  %v424_v13 = vrot.slane %v294_v11, %v834_v6 }
 0x279   :  { %v440_v15 = vrot.slane %v424_v13, %v834_v6  ;;  %v431_v16 = vrot.slane %v417_v12, %v834_v6  ;;  %v432_v19 = vcombine.high %v424_v13, %v424_v13 }
 0x27b   :  { %v469_v17 = vrot.slane %v440_v15, %v873_v14  ;;  %v462_v18 = vcombine.high %v440_v15, %v440_v15  ;;  %v447_v21 = vrot.slane %v431_v16, %v834_v6  ;;  %v454_v22 = vrot.slane %v432_v19, %v834_v6 }
 0x27c   :  { %v433_v27 = vcombine.high %v431_v16, %v431_v16 }
 0x27d   :  { %498 = vrot.lane.b32.xlu1 %v469_v17, %s757_s0  ;;  %v477_v20 = vrot.slane %v462_v18, %v873_v14  ;;  %v485_v4 = vrot.slane %v447_v21, %v873_v14  ;;  %v463_v24 = vcombine.high %v447_v21, %v447_v21  ;;  %v473_v25 = vrot.slane %v454_v22, %v873_v14 }
 0x27e   :  { %v464_v26 = vcombine.high %v454_v22, %v454_v22  ;;  %v461_v30 = vrot.slane %v433_v27, %v834_v6 }
 0x27f   :  { %v493_v28 = vrot.slane %v463_v24, %v873_v14 }
 0x280   :  { %v481_v29 = vrot.slane %v464_v26, %v873_v14  ;;  %v489_v31 = vrot.slane %v461_v30, %v873_v14  ;;  %v465_v62 = vcombine.high %v461_v30, %v461_v30 }
 0x281   :  { %v629_v23 = vpop.eup %628  ;;  %502 = vrot.lane.b32.xlu1 %v477_v20, %s757_s0 }
 0x282   :  { %297 = vrot.lane.b32.xlu0 %v629_v23, %s756_s16 }
 0x285   :  { %506 = vrot.lane.b32.xlu1 %v485_v4, %s757_s0 }
 0x286   :  { %500 = vrot.lane.b32.xlu0 %v473_v25, %s757_s0 }
 0x289   :  { %510 = vrot.lane.b32.xlu1 %v493_v28, %s757_s0 }
 0x28a   :  { %504 = vrot.lane.b32.xlu0 %v481_v29, %s757_s0 }
 0x28e   :  { %508 = vrot.lane.b32.xlu0 %v489_v31, %s757_s0 }
 0x2ef   :  { %v499_v32 = vpop.permute.xlu1 %498 }
 0x2f0   :  { %522 = vst.msk [vmem:[#allocation10] sm:$0x1] %vm407_vm3, %v499_v32 }
 0x2f3   :  { %v503_v33 = vpop.permute.xlu1 %502 }
 0x2f4   :  { %524 = vst.msk [vmem:[#allocation10 + $0x2] sm:$0x1] %vm407_vm3, %v503_v33  ;;  %v298_v34 = vpop.permute.xlu0 %297 }
 0x2f5   :  { %v300_v35 = vmul.f32 %v627_v3, %v298_v34 }
 0x2f7   :  { %v302_v36 = vcombine.high %v300_v35, %v300_v35  ;;  %v309_v37 = vrot.slane %v300_v35, %v834_v6  ;;  %v507_v38 = vpop.permute.xlu1 %506 }
 0x2f8   :  { %526 = vst.msk [vmem:[#allocation10 + $0x4] sm:$0x1] %vm407_vm3, %v507_v38  ;;  %v501_v39 = vpop.permute.xlu0 %500 }
 0x2f9   :  { %v316_v40 = vrot.slane %v302_v36, %v834_v6  ;;  %v317_v41 = vcombine.high %v309_v37, %v309_v37  ;;  %523 = vst.msk [vmem:[#allocation10 + $0x1] sm:$0x1] %vm407_vm3, %v501_v39  ;;  %v325_v42 = vrot.slane %v309_v37, %v834_v6 }
 0x2fb   :  { %v511_v43 = vpop.permute.xlu1 %510  ;;  %v354_v44 = vrot.slane %v325_v42, %v873_v14  ;;  %v339_v45 = vrot.slane %v317_v41, %v834_v6  ;;  %v347_v46 = vcombine.high %v325_v42, %v325_v42  ;;  %v318_v50 = vcombine.high %v316_v40, %v316_v40 }
 0x2fc   :  { %528 = vst.msk [vmem:[#allocation10 + $0x6] sm:$0x1] %vm407_vm3, %v511_v43  ;;  %v505_v47 = vpop.permute.xlu0 %504  ;;  %v332_v52 = vrot.slane %v316_v40, %v834_v6 }
 0x2fd   :  { %525 = vst.msk [vmem:[#allocation10 + $0x3] sm:$0x1] %vm407_vm3, %v505_v47  ;;  %383 = vrot.lane.b32.xlu1 %v354_v44, %s755_s8  ;;  %v358_v48 = vrot.slane %v339_v45, %v873_v14  ;;  %v349_v49 = vcombine.high %v339_v45, %v339_v45  ;;  %v362_v51 = vrot.slane %v347_v46, %v873_v14 }
 0x2fe   :  { %v346_v55 = vrot.slane %v318_v50, %v834_v6  ;;  %v370_v56 = vrot.slane %v332_v52, %v873_v14  ;;  %v348_v57 = vcombine.high %v332_v52, %v332_v52  ;;  %v497_v6 = vrot.slane %v465_v62, %v873_v14 }
 0x2ff   :  { %385 = vrot.lane.b32.xlu0 %v358_v48, %s755_s8  ;;  %v366_v54 = vrot.slane %v349_v49, %v873_v14 }
 0x300   :  { %v509_v53 = vpop.permute.xlu0 %508  ;;  %v374_v58 = vrot.slane %v346_v55, %v873_v14  ;;  %v350_v59 = vcombine.high %v346_v55, %v346_v55  ;;  %v378_v60 = vrot.slane %v348_v57, %v873_v14 }
 0x301   :  { %527 = vst.msk [vmem:[#allocation10 + $0x5] sm:$0x1] %vm407_vm3, %v509_v53  ;;  %387 = vrot.lane.b32.xlu1 %v362_v51, %s755_s8 }
 0x302   :  { %v382_v61 = vrot.slane %v350_v59, %v873_v14 }
 0x303   :  { %389 = vrot.lane.b32.xlu0 %v366_v54, %s755_s8 }
 0x305   :  { %391 = vrot.lane.b32.xlu1 %v370_v56, %s755_s8 }
 0x307   :  { %393 = vrot.lane.b32.xlu0 %v374_v58, %s755_s8 }
 0x309   :  { %395 = vrot.lane.b32.xlu1 %v378_v60, %s755_s8 }
 0x30b   :  { %397 = vrot.lane.b32.xlu0 %v382_v61, %s755_s8 }
 0x30d   :  { %530 = vrot.lane.b32.xlu1 %v300_v35, %s755_s8 }
 0x30f   :  { %512 = vrot.lane.b32.xlu0 %v497_v6, %s757_s0 }
 0x36f   :  { %v384_v63 = vpop.permute.xlu1 %383 }
 0x370   :  { %408 = vst.msk [vmem:[#allocation8] sm:$0x1] %vm407_vm3, %v384_v63 }
 0x371   :  { %v386_v0 = vpop.permute.xlu0 %385 }
 0x372   :  { %409 = vst.msk [vmem:[#allocation8 + $0x1] sm:$0x1] %vm407_vm3, %v386_v0 }
 0x373   :  { %v388_v1 = vpop.permute.xlu1 %387 }
 0x374   :  { %410 = vst.msk [vmem:[#allocation8 + $0x2] sm:$0x1] %vm407_vm3, %v388_v1 }
 0x375   :  { %v390_v2 = vpop.permute.xlu0 %389 }
 0x376   :  { %411 = vst.msk [vmem:[#allocation8 + $0x3] sm:$0x1] %vm407_vm3, %v390_v2 }
 0x377   :  { %v392_v3 = vpop.permute.xlu1 %391 }
 0x378   :  { %412 = vst.msk [vmem:[#allocation8 + $0x4] sm:$0x1] %vm407_vm3, %v392_v3 }
 0x379   :  { %v394_v5 = vpop.permute.xlu0 %393 }
 0x37a   :  { %413 = vst.msk [vmem:[#allocation8 + $0x5] sm:$0x1] %vm407_vm3, %v394_v5 }
 0x37b   :  { %v396_v7 = vpop.permute.xlu1 %395 }
 0x37c   :  { %414 = vst.msk [vmem:[#allocation8 + $0x6] sm:$0x1] %vm407_vm3, %v396_v7 }
 0x37d   :  { %v398_v8 = vpop.permute.xlu0 %397 }
 0x37e   :  { %415 = vst.msk [vmem:[#allocation8 + $0x7] sm:$0x1] %vm407_vm3, %v398_v8 }
 0x37f   :  { %v531_v9 = vpop.permute.xlu1 %530 }
 0x380   :  { %685 = shalt.err (!%p682_p6)
}
 0x381   :  { %s686_s1 = scalar_lea.hbm %s999_s6, 128 }
 0x382   :  { %p687_p7 = scmp.ne.s32.totalorder %s999_s6, %s686_s1  ;;  %p690_p8 = scmp.lt.u32.totalorder %s686_s1, %s999_s6 }
 0x384   :  { %p692_p9 = pnand %p690_p8, %p687_p7 }
 0x386   :  { %695 = shalt.err (!%p692_p9)
}
 0x387   :  { %555 = dma.vmem_to_hbm [thread:$0]  %s550_s17, 128, %s999_s6, [#allocation9], %s749_s11, %s749_s11, %s750_s12   ;;  %533 = vst.msk [vmem:[#allocation7] sm:$0xff] %vm131_vm1, %v531_v9  ;;  %v513_v10 = vpop.permute.xlu0 %512 }
 0x388   :  { %s696_s30 = scalar_lea.vmem %s935_s19, 128  ;;  %p701_p11 = scmp.lt.s32.totalorder %s935_s19, %s935_s19 }
 0x389   :  { %p697_p10 = scmp.ne.s32.totalorder %s935_s19, %s696_s30  ;;  %p702_p12 = scmp.lt.s32.totalorder %s696_s30, %s696_s30 }
 0x38b   :  { %p703_p13 = por %p702_p12, %p701_p11 }
 0x38d   :  { %p704_p0 = pnand %p703_p13, %p697_p10 }
 0x38f   :  { %707 = shalt.err (!%p704_p0)
}
 0x390   :  { %s708_s10 = scalar_lea.hbm %s998_s5, 128 }
 0x391   :  { %p709_p1 = scmp.ne.s32.totalorder %s998_s5, %s708_s10  ;;  %p712_p2 = scmp.lt.u32.totalorder %s708_s10, %s998_s5 }
 0x393   :  { %p714_p3 = pnand %p712_p2, %p709_p1 }
 0x395   :  { %717 = shalt.err (!%p714_p3)
}
 0x396   :  { %543 = dma.vmem_to_hbm [thread:$0]  %s935_s19, 128, %s998_s5, [#allocation4]   ;;  %529 = vst.msk [vmem:[#allocation10 + $0x7] sm:$0x1] %vm407_vm3, %v513_v10 }
 0x397   :  { %s718_s0 = scalar_lea.vmem %s953_s21, 128  ;;  %p723_p5 = scmp.lt.s32.totalorder %s953_s21, %s953_s21 }
 0x398   :  { %p719_p4 = scmp.ne.s32.totalorder %s953_s21, %s718_s0  ;;  %p724_p6 = scmp.lt.s32.totalorder %s718_s0, %s718_s0 }
 0x39a   :  { %p725_p7 = por %p724_p6, %p723_p5 }
 0x39c   :  { %p726_p8 = pnand %p725_p7, %p719_p4 }
 0x39e   :  { %729 = shalt.err (!%p726_p8)
}
 0x39f   :  { %s730_s18 = scalar_lea.hbm %s1000_s7, 128 }
 0x3a0   :  { %p731_p9 = scmp.ne.s32.totalorder %s1000_s7, %s730_s18  ;;  %p734_p10 = scmp.lt.u32.totalorder %s730_s18, %s1000_s7 }
 0x3a2   :  { %p736_p11 = pnand %p734_p10, %p731_p9 }
 0x3a4   :  { %739 = shalt.err (!%p736_p11)
}
 0x3a5   :  { %567 = dma.vmem_to_hbm [thread:$0]  %s953_s21, 128, %s1000_s7, [#allocation9], %s749_s11, %s749_s11, %s750_s12  }
 0x3a6   :  { %744 = dma.done.wait [#allocation4], 128  }
 0x3a7   :  { %745 = vsyncadd [#allocation4], 4294967168 }
 0x3a8   :  { %746 = dma.done.wait [#allocation9], 256  }
 0x3a9   :  { %747 = vsyncadd [#allocation9], 4294967040 }
 0x3aa   :  { %577 = vsyncpa [#allocation3], 1 }
 0x3ab   :  { %578 = vsyncpa [#allocation6], 1 }
 0x3ac   :  { %579 = vsyncpa [#allocation4], 1 }
 0x3ad   :  { %580 = vsyncpa [#allocation9], 1 }

</bundles_post_ra>
